<compile_context>
chip_gen: v6e
topology: v6e:2x2x1
jax: 0.10.0
libtpu: 0.0.40
codegen_flags: <defaults>
</compile_context>

<pallas_src>
import jax
import jax.numpy as jnp
from jax.experimental import pallas as pl
from jax.experimental.pallas import tpu as pltpu


def _luong_dot_kernel(q_ref, v_ref, ctx_ref, attn_ref):
    # q_ref:    (TB, H)     query tile
    # v_ref:    (TB, S, H)  values tile
    # ctx_ref:  (TB, H)     context-vector output tile
    # attn_ref: (TB, S)     attention-weight output tile (lane-dense)
    q = q_ref[...]                                  # (TB, H), input dtype
    v = v_ref[...]                                  # (TB, S, H), input dtype

    # score_{b,s} = sum_h v_{b,s,h} * q_{b,h}
    # Multiply on the VPU in the native dtype; accumulate the lane reduce in f32.
    prod = v * q[:, None, :]                        # (TB, S, H)
    score = jnp.sum(prod.astype(jnp.float32), axis=-1)      # (TB, S) f32

    # Numerically stable softmax over the sequence axis (PyTorch dim=1).
    m = jnp.max(score, axis=-1, keepdims=True)      # (TB, 1)
    e = jnp.exp(score - m)                          # (TB, S)
    denom = jnp.sum(e, axis=-1, keepdims=True)      # (TB, 1)
    w = e / denom                                   # exact normalization (f32)

    attn_ref[...] = w.astype(attn_ref.dtype)

    # context_{b,h} = sum_s w_{b,s} * v_{b,s,h}
    wv = w.astype(v_ref.dtype)[:, :, None] * v      # (TB, S, H), native dtype
    ctx = jnp.sum(wv.astype(jnp.float32), axis=1)   # (TB, H) f32 accumulation
    ctx_ref[...] = ctx.astype(ctx_ref.dtype)


def _round_up(x, m):
    return ((x + m - 1) // m) * m


def _tensorcores_per_chip():
    """2 on v7x (2 TCs/chip), 1 on v5e/v6e; conservative fallback is 1."""
    try:
        kind = jax.devices()[0].device_kind.lower()
    except Exception:
        return 1
    return 2 if ("v7" in kind or "tpu7" in kind) else 1


def _choose_batch_tile(B, S, H, itemsize):
    """Pick batch tile TB and a vmem_limit_bytes for the pallas_call.

    The values tile dominates HBM traffic (kernel is ~1 flop/byte), so size it
    to ~4 MiB of *padded* VMEM (lane dim -> multiple of 128, sublane dim ->
    dtype packing multiple), which keeps 2x double-buffered inputs/outputs
    plus compiler temps comfortably under v7x's 64 MiB physical VMEM while
    amortizing the ~0.35 us/grid-step overhead on all generations.
    """
    sublane = max(8, 32 // max(itemsize, 1))        # 8 (f32) / 16 (bf16) / 32 (i8)
    h_lanes = _round_up(H, 128)
    s_sub = _round_up(S, sublane)
    s_lanes = _round_up(S, 128)

    v_row = s_sub * h_lanes * itemsize              # values tile, per batch row
    aux_row = (2 * h_lanes + s_lanes) * itemsize    # q + ctx + attn tiles, per row

    target = 4 << 20                                # ~4 MiB of padded values/tile
    tb = max(8, ((target // max(v_row, 1)) // 8) * 8)

    if tb >= B:
        # The whole batch fits in one tile; take it exactly (no edge block).
        tb = B
        if _tensorcores_per_chip() >= 2 and B > 16:
            # Give both v7x TensorCores work, but only if each half stays a
            # multi-MiB tile (don't re-enter the per-step-overhead regime).
            half = _round_up((B + 1) // 2, 8)
            if half < B and half * v_row >= (2 << 20):
                tb = half
    # else: tb is a multiple of 8; the last grid block may be partial
    # (reads are garbage-confined per row, writes are masked by Pallas).

    # Double-buffered pipeline footprint + generous headroom for the
    # (TB,S,H)-shaped products / f32 score temps, capped under v7x VMEM.
    est = 2 * tb * (v_row + aux_row)
    vmem_limit = int(min(48 << 20, max(32 << 20, 2 * est + (8 << 20))))
    return tb, vmem_limit


def luong_attention_dot(query, values):
    """query: (1, B, H); values: (B, S, H) -> (context (B, H), attn (B, S, 1))."""
    q = jnp.squeeze(query, 0)                       # (B, H)
    B, H = q.shape
    _, S, _ = values.shape

    dtype = values.dtype
    itemsize = jnp.dtype(dtype).itemsize
    TB, vmem_limit = _choose_batch_tile(B, S, H, itemsize)
    n_tiles = pl.cdiv(B, TB)

    ctx, attn2d = pl.pallas_call(
        _luong_dot_kernel,
        out_shape=(
            jax.ShapeDtypeStruct((B, H), dtype),
            jax.ShapeDtypeStruct((B, S), dtype),    # lane-dense attn slab
        ),
        grid_spec=pltpu.PrefetchScalarGridSpec(
            num_scalar_prefetch=0,
            grid=(n_tiles,),
            in_specs=[
                pl.BlockSpec((TB, H), lambda b: (b, 0)),
                pl.BlockSpec((TB, S, H), lambda b: (b, 0, 0)),
            ],
            out_specs=[
                pl.BlockSpec((TB, H), lambda b: (b, 0)),
                pl.BlockSpec((TB, S), lambda b: (b, 0)),
            ],
        ),
        compiler_params=pltpu.CompilerParams(
            dimension_semantics=("parallel",),
            vmem_limit_bytes=vmem_limit,
        ),
    )(q, values)

    attn = attn2d.reshape(B, S, 1)                  # match PyTorch (B, S, 1)
    return ctx, attn


def _reference(query, values):
    # Pure elementwise/sum formulation (avoids TPU default-precision matmul
    # differences); mathematically identical to the PyTorch module.
    q = jnp.squeeze(query, 0)                               # (B, H)
    score = jnp.sum(values * q[:, None, :], axis=-1, keepdims=True)  # (B, S, 1)
    attn = jax.nn.softmax(score, axis=1)                    # (B, S, 1)
    ctx = jnp.sum(attn * values, axis=1)                    # (B, H)
    return ctx, attn


if __name__ == "__main__":
    B, S, H = 2, 8, 32
    key = jax.random.PRNGKey(0)
    kq, kv = jax.random.split(key)
    query = jax.random.normal(kq, (1, B, H), dtype=jnp.float32)
    values = jax.random.normal(kv, (B, S, H), dtype=jnp.float32)

    ctx, attn = luong_attention_dot(query, values)
    jax.block_until_ready((ctx, attn))

    ctx_ref, attn_ref = _reference(query, values)
    assert ctx.shape == (B, H) and attn.shape == (B, S, 1)
    assert jnp.allclose(ctx, ctx_ref, atol=1e-4, rtol=1e-4)
    assert jnp.allclose(attn, attn_ref, atol=1e-4, rtol=1e-4)

    print("KERNEL_OK")
</pallas_src>

<mosaic_0001>
module attributes {stable_mosaic.version = 11 : i64} {
  func.func @_luong_dot_kernel(%arg0: i32, %arg1: memref<2x32xf32, #tpu.memory_space<vmem>>, %arg2: memref<2x8x32xf32, #tpu.memory_space<vmem>>, %arg3: memref<2x32xf32, #tpu.memory_space<vmem>>, %arg4: memref<2x8xf32, #tpu.memory_space<vmem>>) attributes {dimension_semantics = [#tpu.dimension_semantics<parallel>], iteration_bounds = array<i64: 1>, scalar_prefetch = 0 : i64, scratch_operands = 0 : i64, tpu.core_type = #tpu.core_type<tc>, window_params = [{transform_indices = @transform_0, window_bounds = array<i64: 2, 32>}, {transform_indices = @transform_1, window_bounds = array<i64: 2, 8, 32>}, {transform_indices = @transform_2, window_bounds = array<i64: 2, 32>}, {transform_indices = @transform_3, window_bounds = array<i64: 2, 8>}]} {
    %c0 = arith.constant 0 : index
    %c0_0 = arith.constant 0 : index
    %0 = vector.load %arg1[%c0, %c0_0] : memref<2x32xf32, #tpu.memory_space<vmem>>, vector<2x32xf32>
    %c0_1 = arith.constant 0 : index
    %c0_2 = arith.constant 0 : index
    %c0_3 = arith.constant 0 : index
    %1 = vector.load %arg2[%c0_1, %c0_2, %c0_3] : memref<2x8x32xf32, #tpu.memory_space<vmem>>, vector<2x8x32xf32>
    %2 = vector.shape_cast %0 : vector<2x32xf32> to vector<2x1x32xf32>
    %3 = vector.broadcast %2 : vector<2x1x32xf32> to vector<2x8x32xf32>
    %4 = arith.mulf %1, %3 : vector<2x8x32xf32>
    %cst = arith.constant dense<0.000000e+00> : vector<2x8xf32>
    %5 = vector.multi_reduction <add>, %4, %cst [2] : vector<2x8x32xf32> to vector<2x8xf32>
    %cst_4 = arith.constant dense<0xFF800000> : vector<2xf32>
    %6 = vector.multi_reduction <maximumf>, %5, %cst_4 [1] : vector<2x8xf32> to vector<2xf32>
    %7 = vector.shape_cast %6 : vector<2xf32> to vector<2x1xf32>
    %8 = vector.broadcast %7 : vector<2x1xf32> to vector<2x8xf32>
    %9 = arith.subf %5, %8 : vector<2x8xf32>
    %10 = math.exp %9 : vector<2x8xf32>
    %cst_5 = arith.constant dense<0.000000e+00> : vector<2xf32>
    %11 = vector.multi_reduction <add>, %10, %cst_5 [1] : vector<2x8xf32> to vector<2xf32>
    %12 = vector.shape_cast %11 : vector<2xf32> to vector<2x1xf32>
    %13 = vector.broadcast %12 : vector<2x1xf32> to vector<2x8xf32>
    %14 = arith.divf %10, %13 : vector<2x8xf32>
    %c0_6 = arith.constant 0 : index
    %c0_7 = arith.constant 0 : index
    %15 = vector.load %arg4[%c0_6, %c0_7] : memref<2x8xf32, #tpu.memory_space<vmem>>, vector<2x8xf32>
    tpu.vector_store %arg4[%c0_6, %c0_7], %14 {strides = array<i32>} : memref<2x8xf32, #tpu.memory_space<vmem>>, vector<2x8xf32>,
    %16 = vector.shape_cast %14 : vector<2x8xf32> to vector<2x8x1xf32>
    %17 = vector.broadcast %16 : vector<2x8x1xf32> to vector<2x8x32xf32>
    %18 = arith.mulf %17, %1 : vector<2x8x32xf32>
    %cst_8 = arith.constant dense<0.000000e+00> : vector<2x32xf32>
    %19 = vector.multi_reduction <add>, %18, %cst_8 [1] : vector<2x8x32xf32> to vector<2x32xf32>
    %c0_9 = arith.constant 0 : index
    %c0_10 = arith.constant 0 : index
    %20 = vector.load %arg3[%c0_9, %c0_10] : memref<2x32xf32, #tpu.memory_space<vmem>>, vector<2x32xf32>
    tpu.vector_store %arg3[%c0_9, %c0_10], %19 {strides = array<i32>} : memref<2x32xf32, #tpu.memory_space<vmem>>, vector<2x32xf32>,
    return
  }
  func.func @transform_0(%arg0: i32) -> (i32, i32) {
    %c0_i32 = arith.constant 0 : i32
    %c0_i32_0 = arith.constant 0 : i32
    return %arg0, %c0_i32 : i32, i32
  }
  func.func @transform_1(%arg0: i32) -> (i32, i32, i32) {
    %c0_i32 = arith.constant 0 : i32
    %c0_i32_0 = arith.constant 0 : i32
    %c0_i32_1 = arith.constant 0 : i32
    return %arg0, %c0_i32, %c0_i32_0 : i32, i32, i32
  }
  func.func @transform_2(%arg0: i32) -> (i32, i32) {
    %c0_i32 = arith.constant 0 : i32
    %c0_i32_0 = arith.constant 0 : i32
    return %arg0, %c0_i32 : i32, i32
  }
  func.func @transform_3(%arg0: i32) -> (i32, i32) {
    %c0_i32 = arith.constant 0 : i32
    %c0_i32_0 = arith.constant 0 : i32
    return %arg0, %c0_i32 : i32, i32
  }
}

</mosaic_0001>

<bundles_post_ra>
// kernel: tpu_custom_call.1
= control target key start
LH: loop header
LB: loop body
LE: loop exit
PB: predicated region body
PF: predicated region fallthrough
CT: control target
= control target key end

     0   :  { %9 = vsyncpa [#allocation3], 0  ;;  %s397_s0 = inlined_call_operand.hbm [shape: f32[2,32], index: 0, kind: input, shape index: {}]   ;;  %s398_s1 = inlined_call_operand.hbm [shape: f32[2,8,32], index: 1, kind: input, shape index: {}]   ;;  %s399_s2 = inlined_call_operand.hbm [shape: f32[2,32], index: 2, kind: output, shape index: {0}]   ;;  %s400_s3 = inlined_call_operand.hbm [shape: f32[2,8], index: 3, kind: output, shape index: {1}]  }
   0x1   :  { %10 = vsyncpa [#allocation6], 0 }
   0x2   :  { %11 = vsyncpa [#allocation4], 0 }
   0x3   :  { %12 = vsyncpa [#allocation9], 0  ;;  %s338_s12 = smov [#allocation2]   ;;  %s339_s14 = smov [#allocation5]  }
   0x4   :  { %s19_s13 = sshll.u32 %s338_s12, 4  ;;  %s28_s15 = sshll.u32 %s339_s14, 4  ;;  %s20_s13 = int_to_ptr.vmem [resolvable:$true] %s19_s13  ;;  %s29_s15 = int_to_ptr.vmem [resolvable:$true] %s28_s15 }
   0x5   :  { %s258_s16 = scalar_lea.vmem %s20_s13, 32  ;;  %p263_p1 = scmp.lt.s32.totalorder %s20_s13, %s20_s13 }
   0x6   :  { %p259_p0 = scmp.ne.s32.totalorder %s20_s13, %s258_s16  ;;  %p264_p2 = scmp.lt.s32.totalorder %s258_s16, %s258_s16 }
   0x8   :  { %p265_p3 = por %p264_p2, %p263_p1 }
   0xa   :  { %p266_p4 = pnand %p265_p3, %p259_p0 }
   0xc   :  { %269 = shalt.err (!%p266_p4)
}
   0xd   :  { %22 = dma.hbm_to_vmem [thread:$0]  %s397_s0, 32, %s20_s13, [#allocation3]  }
   0xe   :  { %s278_s19 = scalar_lea.vmem %s29_s15, 256  ;;  %p283_p6 = scmp.lt.s32.totalorder %s29_s15, %s29_s15 }
   0xf   :  { %p279_p5 = scmp.ne.s32.totalorder %s29_s15, %s278_s19  ;;  %p284_p7 = scmp.lt.s32.totalorder %s278_s19, %s278_s19 }
  0x11   :  { %p285_p8 = por %p284_p7, %p283_p6 }
  0x13   :  { %p286_p9 = pnand %p285_p8, %p279_p5 }
  0x15   :  { %289 = shalt.err (!%p286_p9)
}
  0x16   :  { %s340_s20 = smov 128   ;;  %s341_s21 = smov 8  }
  0x17   :  { %34 = dma.hbm_to_vmem [thread:$0]  %s398_s1, 256, %s29_s15, [#allocation6], %s340_s20, %s340_s20, %s341_s21  }
  0x18   :  { %330 = dma.done.wait [#allocation3], 32  }
  0x19   :  { %331 = vsyncadd [#allocation3], 4294967264 }
  0x1a   :  { %332 = dma.done.wait [#allocation6], 256  }
  0x1b   :  { %333 = vsyncadd [#allocation6], 4294967040  ;;  %v56_v0 = vlaneseq  ;;  %v342_v1 = vmov 1966171168   ;;  %v42_v12 = vld [vmem:[#allocation5] sm:$0xff]  ;;  %vm79_vm0 = vcmask 261120  }
  0x1c   :  { %v54_v2 = vunpack.c.l.s4 %v342_v1  ;;  %v231_v9 = vld.sshfl [vmem:[#allocation2] sm:$0x11 pattern:$0x75316420]  ;;  %v43_v15 = vld [vmem:[#allocation5 + $0x8] sm:$0xff]  ;;  %vm98_vm1 = vcmask 1041409  }
  0x1d   :  { %v57_v3 = vshrl.u32 %v56_v0, 7  ;;  %v89_v4 = vand.u32 127, %v56_v0  ;;  %v52_v11 = vcombine.high %v231_v9, %v231_v9  ;;  %vm101_vm2 = vcmask 58368   ;;  %s344_s0 = smov [#allocation8]  }
  0x1e   :  { %v55_v5 = vunpack.c.0.s8 %v54_v2  ;;  %v343_v27 = vmov 0   ;;  %s217_s1 = sshll.u32 %s344_s0, 4  ;;  %s218_s1 = int_to_ptr.vmem [resolvable:$true] %s217_s1 }
  0x1f   :  { %v372_v6 = vsub.s32 %v89_v4, %v57_v3  ;;  %v69_v8 = vsub.s32 0, %v57_v3  ;;  %241 = vset.pattern.permute.xlu0 %v343_v27  ;;  %240 = vset.pattern.permute.xlu1 %v343_v27  ;;  %v112_v28 = vsub.s32 1, %v57_v3  ;;  %s290_s24 = scalar_lea.vmem %s218_s1, 32  ;;  %p295_p11 = scmp.lt.s32.totalorder %s218_s1, %s218_s1 }
  0x20   :  { %v58_v7 = vsub.s32 %v55_v5, %v57_v3  ;;  %p291_p10 = scmp.ne.s32.totalorder %s218_s1, %s290_s24  ;;  %p296_p12 = scmp.lt.s32.totalorder %s290_s24, %s290_s24 }
  0x22   :  { %v59_v10 = vrot.slane %v231_v9, %v58_v7  ;;  %v66_v14 = vrot.slane %v52_v11, %v58_v7  ;;  %p297_p13 = por %p296_p12, %p295_p11 }
  0x24   :  { %v70_v13 = vrot.slane %v59_v10, %v69_v8  ;;  %v74_v17 = vrot.slane %v66_v14, %v69_v8  ;;  %p298_p0 = pnand %p297_p13, %p291_p10 }
  0x26   :  { %v77_v16 = vmul.f32 %v70_v13, %v42_v12  ;;  %v78_v19 = vmul.f32 %v74_v17, %v43_v15 }
  0x28   :  { %v80_v18 = vsel %vm79_vm0, %v77_v16, 0.0  ;;  %v83_v20 = vsel %vm79_vm0, %v78_v19, 0.0 }
  0x29   :  { %81 = vadd.xlane.f32.xlu0 %v80_v18 }
  0x2d   :  { %84 = vadd.xlane.f32.xlu0 %v83_v20 }
  0xb2   :  { %v82_v21 = vpop.xlane.xlu0 %81 }
  0xb3   :  { %v93_v23 = vrot.slane %v82_v21, %v372_v6 }
  0xb6   :  { %v85_v22 = vpop.xlane.xlu0 %84 }
  0xb7   :  { %v97_v24 = vrot.slane %v85_v22, %v372_v6 }
  0xb9   :  { %v99_v25 = vsel %vm98_vm1, %v97_v24, %v93_v23 }
  0xba   :  { %v102_v26 = vsel %vm101_vm2, %v99_v25, -inf }
  0xbb   :  { %103 = vmax.xlane.f32.xlu1 %v102_v26 }
 0x144   :  { %v104_v29 = vpop.xlane.xlu1 %103 }
 0x145   :  { %v109_v30 = vrot.slane %v104_v29, %v69_v8  ;;  %v113_v31 = vrot.slane %v104_v29, %v112_v28 }
 0x147   :  { %v116_v32 = vsub.f32 %v82_v21, %v109_v30  ;;  %v117_v33 = vsub.f32 %v85_v22, %v113_v31 }
 0x149   :  { %v118_v34 = vmul.f32 1.442695, %v116_v32  ;;  %v120_v35 = vmul.f32 1.442695, %v117_v33 }
 0x14b   :  { %242 = vpow2.f32 %v118_v34 }
 0x14c   :  { %244 = vpow2.f32 %v120_v35 }
 0x158   :  { %v243_v36 = vpop.eup %242 }
 0x159   :  { %v245_v37 = vpop.eup %244  ;;  %125 = vperm.xlu1 %240, %v243_v36  }
 0x15a   :  { %128 = vperm.xlu0 %241, %v245_v37  }
 0x1d4   :  { %v126_v38 = vpop.permute.xlu1 %125 }
 0x1d5   :  { %v129_v39 = vpop.permute.xlu0 %128  ;;  %v133_v40 = vrot.slane %v126_v38, %v372_v6 }
 0x1d6   :  { %v137_v41 = vrot.slane %v129_v39, %v372_v6 }
 0x1d8   :  { %v138_v42 = vsel %vm98_vm1, %v137_v41, %v133_v40 }
 0x1d9   :  { %v140_v43 = vsel %vm101_vm2, %v138_v42, 0.0 }
 0x1da   :  { %141 = vadd.xlane.f32.xlu1 %v140_v43 }
 0x263   :  { %v142_v44 = vpop.xlane.xlu1 %141 }
 0x264   :  { %v147_v45 = vrot.slane %v142_v44, %v69_v8  ;;  %v151_v46 = vrot.slane %v142_v44, %v112_v28 }
 0x266   :  { %246 = vrcp.f32 %v147_v45 }
 0x267   :  { %248 = vrcp.f32 %v151_v46 }
 0x273   :  { %v247_v47 = vpop.eup %246 }
 0x274   :  { %v155_v48 = vmul.f32 %v247_v47, %v243_v36  ;;  %v249_v49 = vpop.eup %248 }
 0x275   :  { %v157_v50 = vmul.f32 %v249_v49, %v245_v37 }
 0x276   :  { %161 = vperm.xlu0 %241, %v155_v48  }
 0x27a   :  { %164 = vperm.xlu0 %241, %v157_v50  }
 0x2f1   :  { %v162_v51 = vpop.permute.xlu0 %161 }
 0x2f2   :  { %v179_v52 = vmul.f32 %v162_v51, %v42_v12  ;;  %v169_v56 = vrot.slane %v162_v51, %v372_v6 }
 0x2f4   :  { %v181_v53 = vsel %vm79_vm0, %v179_v52, 0.0 }
 0x2f5   :  { %v182_v54 = vrot.slane %v181_v53, 4  ;;  %v165_v55 = vpop.permute.xlu0 %164 }
 0x2f6   :  { %v173_v57 = vrot.slane %v165_v55, %v372_v6  ;;  %v180_v58 = vmul.f32 %v165_v55, %v43_v15 }
 0x2f7   :  { %v183_v59 = vadd.f32 %v182_v54, %v181_v53 }
 0x2f8   :  { %v188_v60 = vsel %vm79_vm0, %v180_v58, 0.0  ;;  %v174_v61 = vsel %vm98_vm1, %v173_v57, %v169_v56 }
 0x2f9   :  { %v184_v62 = vrot.slane %v183_v59, 2  ;;  %v189_v63 = vrot.slane %v188_v60, 4  ;;  %176 = vst.msk [vmem:[#allocation8] sm:$0x3] %vm101_vm2, %v174_v61 }
 0x2fa   :  { %301 = shalt.err (!%p298_p0)
}
 0x2fb   :  { %220 = dma.vmem_to_hbm [thread:$0]  %s218_s1, 32, %s400_s3, [#allocation9]   ;;  %v185_v0 = vadd.f32 %v184_v62, %v183_v59  ;;  %v190_v1 = vadd.f32 %v189_v63, %v188_v60  ;;  %vm199_vm3 = vcmask 254976  }
 0x2fc   :  { %s345_s27 = smov [#allocation7]  }
 0x2fd   :  { %v191_v2 = vrot.slane %v190_v1, 2  ;;  %v186_v3 = vrot.slane %v185_v0, 1  ;;  %s207_s28 = sshll.u32 %s345_s27, 4  ;;  %s208_s28 = int_to_ptr.vmem [resolvable:$true] %s207_s28 }
 0x2fe   :  { %s310_s29 = scalar_lea.vmem %s208_s28, 32  ;;  %p315_p2 = scmp.lt.s32.totalorder %s208_s28, %s208_s28 }
 0x2ff   :  { %v192_v4 = vadd.f32 %v191_v2, %v190_v1  ;;  %v187_v7 = vadd.f32 %v186_v3, %v185_v0  ;;  %p311_p1 = scmp.ne.s32.totalorder %s208_s28, %s310_s29  ;;  %p316_p3 = scmp.lt.s32.totalorder %s310_s29, %s310_s29 }
 0x301   :  { %v193_v5 = vrot.slane %v192_v4, 1  ;;  %p317_p4 = por %p316_p3, %p315_p2 }
 0x303   :  { %v194_v6 = vadd.f32 %v193_v5, %v192_v4  ;;  %p318_p5 = pnand %p317_p4, %p311_p1 }
 0x305   :  { %v197_v8 = vsel %vm98_vm1, %v194_v6, %v187_v7 }
 0x306   :  { %200 = vst.msk [vmem:[#allocation7] sm:$0x3] %vm199_vm3, %v197_v8 }
 0x307   :  { %321 = shalt.err (!%p318_p5)
}
 0x308   :  { %210 = dma.vmem_to_hbm [thread:$0]  %s208_s28, 32, %s399_s2, [#allocation4]  }
 0x309   :  { %334 = dma.done.wait [#allocation4], 32  }
 0x30a   :  { %335 = vsyncadd [#allocation4], 4294967264 }
 0x30b   :  { %336 = dma.done.wait [#allocation9], 32  }
 0x30c   :  { %337 = vsyncadd [#allocation9], 4294967264 }
 0x30d   :  { %227 = vsyncpa [#allocation3], 1 }
 0x30e   :  { %228 = vsyncpa [#allocation6], 1 }
 0x30f   :  { %229 = vsyncpa [#allocation4], 1 }
 0x310   :  { %230 = vsyncpa [#allocation9], 1 }

</bundles_post_ra>
